<compile_context>
chip_gen: v7x
topology: tpu7x:2x2x1
jax: 0.10.0
libtpu: 0.0.40
codegen_flags: <defaults>
</compile_context>

<pallas_src>
import jax
import jax.numpy as jnp
from jax.experimental import pallas as pl
from jax.experimental.pallas import tpu as pltpu


def _round_up(x, m):
    return (x + m - 1) // m * m


def mlp_kernel(x_ref, w1_ref, b1_ref, w2_ref, b2_ref, o_ref):
    # Linear1 + clamp(min=0), fully fused in VMEM (f32 MXU accumulation).
    h = jnp.dot(x_ref[...], w1_ref[...], preferred_element_type=jnp.float32)
    h = jnp.maximum(h + b1_ref[...], 0.0)          # (tn, H) + (1, H) broadcast
    # Linear2.
    y = jnp.dot(h, w2_ref[...], preferred_element_type=jnp.float32)
    o_ref[...] = (y + b2_ref[...]).astype(o_ref.dtype)


def netwerk_forward(x, w1, b1, w2, b2, *, block_n=1024):
    """x: (N, D_in); w1: (D_in, H); b1: (1, H); w2: (H, D_out); b2: (1, D_out).

    Parameters are expected in the pre-transposed (x @ W) layout; no per-call
    padding or re-layout of weights is performed.
    """
    N, D_in = x.shape
    H = w1.shape[1]
    D_out = w2.shape[1]

    # --- Tile only the batch dimension. ---
    # Clamp the tile to the (8-aligned) problem size so small N runs in a
    # single grid step; large N streams 1024-row tiles (fits VMEM with big
    # margin on every generation: ~a few hundred KiB double-buffered).
    n_p8 = _round_up(N, 8)
    tn = min(block_n, n_p8)            # both multiples of 8 -> tn multiple of 8
    N_p = _round_up(N, tn)
    if N_p != N:
        x = jnp.pad(x, ((0, N_p - N), (0, 0)))

    grid = (N_p // tn,)

    out = pl.pallas_call(
        mlp_kernel,
        out_shape=jax.ShapeDtypeStruct((N_p, D_out), x.dtype),
        grid=grid,
        in_specs=[
            # x: streamed batch tiles (double-buffered by BlockSpec pipelining).
            pl.BlockSpec((tn, D_in), lambda i: (i, 0)),
            # Weights & biases: constant block index => loaded once, VMEM-resident.
            pl.BlockSpec((D_in, H), lambda i: (0, 0)),
            pl.BlockSpec((1, H), lambda i: (0, 0)),
            pl.BlockSpec((H, D_out), lambda i: (0, 0)),
            pl.BlockSpec((1, D_out), lambda i: (0, 0)),
        ],
        # Unpadded D_out: last block dim equals the full array dim (allowed);
        # masked vst costs less than 8x-inflated HBM write traffic.
        out_specs=pl.BlockSpec((tn, D_out), lambda i: (i, 0)),
        compiler_params=pltpu.CompilerParams(
            dimension_semantics=("parallel",),
        ),
    )(x, w1, b1, w2, b2)

    # Strip batch padding (no-op for the shipped shape: grid=(1,), N_p == N).
    return out if N_p == N else out[:N]


def reference_forward(x, w1, b1, w2, b2):
    h = jnp.maximum(x @ w1 + b1, 0.0)
    return h @ w2 + b2


if __name__ == "__main__":
    # Shapes consistent with the module.  N=512 now runs as a single grid step.
    N, D_in, H, D_out = 512, 32, 64, 16

    key = jax.random.PRNGKey(0)
    kx, k1, kb1, k2, kb2 = jax.random.split(key, 5)

    x = jax.random.normal(kx, (N, D_in), dtype=jnp.float32)

    # Deterministic parameter init (uniform in +/- 1/sqrt(fan_in), like nn.Linear),
    # already in the kernel's (D_in,H)/(H,D_out) layout -- done once at "init".
    lim1 = 1.0 / (D_in ** 0.5)
    w1 = jax.random.uniform(k1, (D_in, H), minval=-lim1, maxval=lim1, dtype=jnp.float32)
    b1 = jax.random.uniform(kb1, (1, H), minval=-lim1, maxval=lim1, dtype=jnp.float32)
    lim2 = 1.0 / (H ** 0.5)
    w2 = jax.random.uniform(k2, (H, D_out), minval=-lim2, maxval=lim2, dtype=jnp.float32)
    b2 = jax.random.uniform(kb2, (1, D_out), minval=-lim2, maxval=lim2, dtype=jnp.float32)

    y = jax.block_until_ready(netwerk_forward(x, w1, b1, w2, b2))
    y_ref = reference_forward(x, w1, b1, w2, b2)

    assert y.shape == (N, D_out)
    assert jnp.allclose(y, y_ref, atol=1e-5, rtol=1e-5)
    print("KERNEL_OK")
</pallas_src>

<mosaic_0001>
module attributes {stable_mosaic.version = 11 : i64} {
  func.func @mlp_kernel(%arg0: i32, %arg1: memref<512x32xf32, #tpu.memory_space<vmem>>, %arg2: memref<32x64xf32, #tpu.memory_space<vmem>>, %arg3: memref<1x64xf32, #tpu.memory_space<vmem>>, %arg4: memref<64x16xf32, #tpu.memory_space<vmem>>, %arg5: memref<1x16xf32, #tpu.memory_space<vmem>>, %arg6: memref<512x16xf32, #tpu.memory_space<vmem>>) attributes {dimension_semantics = [#tpu.dimension_semantics<parallel>], iteration_bounds = array<i64: 1>, scalar_prefetch = 0 : i64, scratch_operands = 0 : i64, tpu.core_type = #tpu.core_type<tc>, window_params = [{transform_indices = @transform_0, window_bounds = array<i64: 512, 32>}, {pipeline_mode = #tpu.pipeline_mode<synchronous>, transform_indices = @transform_1, window_bounds = array<i64: 32, 64>}, {pipeline_mode = #tpu.pipeline_mode<synchronous>, transform_indices = @transform_2, window_bounds = array<i64: 1, 64>}, {pipeline_mode = #tpu.pipeline_mode<synchronous>, transform_indices = @transform_3, window_bounds = array<i64: 64, 16>}, {pipeline_mode = #tpu.pipeline_mode<synchronous>, transform_indices = @transform_4, window_bounds = array<i64: 1, 16>}, {transform_indices = @transform_5, window_bounds = array<i64: 512, 16>}]} {
    %c0 = arith.constant 0 : index
    %c0_0 = arith.constant 0 : index
    %0 = vector.load %arg1[%c0, %c0_0] : memref<512x32xf32, #tpu.memory_space<vmem>>, vector<512x32xf32>
    %c0_1 = arith.constant 0 : index
    %c0_2 = arith.constant 0 : index
    %1 = vector.load %arg2[%c0_1, %c0_2] : memref<32x64xf32, #tpu.memory_space<vmem>>, vector<32x64xf32>
    %cst = arith.constant dense<0.000000e+00> : vector<512x64xf32>
    %2 = tpu.matmul %0, %1, %cst {dimension_numbers = #tpu.dot_dimension_numbers<[1], [0], [0], [1], [0, 0, 1, 1], [], []>} : vector<512x32xf32>, vector<32x64xf32>, vector<512x64xf32> -> vector<512x64xf32>
    %c0_3 = arith.constant 0 : index
    %c0_4 = arith.constant 0 : index
    %3 = vector.load %arg3[%c0_3, %c0_4] : memref<1x64xf32, #tpu.memory_space<vmem>>, vector<1x64xf32>
    %4 = vector.broadcast %3 : vector<1x64xf32> to vector<512x64xf32>
    %5 = arith.addf %2, %4 : vector<512x64xf32>
    %cst_5 = arith.constant 0.000000e+00 : f32
    %6 = vector.broadcast %cst_5 : f32 to vector<512x64xf32>
    %7 = arith.maximumf %5, %6 : vector<512x64xf32>
    %c0_6 = arith.constant 0 : index
    %c0_7 = arith.constant 0 : index
    %8 = vector.load %arg4[%c0_6, %c0_7] : memref<64x16xf32, #tpu.memory_space<vmem>>, vector<64x16xf32>
    %cst_8 = arith.constant dense<0.000000e+00> : vector<512x16xf32>
    %9 = tpu.matmul %7, %8, %cst_8 {dimension_numbers = #tpu.dot_dimension_numbers<[1], [0], [0], [1], [0, 0, 1, 1], [], []>} : vector<512x64xf32>, vector<64x16xf32>, vector<512x16xf32> -> vector<512x16xf32>
    %c0_9 = arith.constant 0 : index
    %c0_10 = arith.constant 0 : index
    %10 = vector.load %arg5[%c0_9, %c0_10] : memref<1x16xf32, #tpu.memory_space<vmem>>, vector<1x16xf32>
    %11 = vector.broadcast %10 : vector<1x16xf32> to vector<512x16xf32>
    %12 = arith.addf %9, %11 : vector<512x16xf32>
    %c0_11 = arith.constant 0 : index
    %c0_12 = arith.constant 0 : index
    %13 = vector.load %arg6[%c0_11, %c0_12] : memref<512x16xf32, #tpu.memory_space<vmem>>, vector<512x16xf32>
    tpu.vector_store %arg6[%c0_11, %c0_12], %12 {strides = array<i32>} : memref<512x16xf32, #tpu.memory_space<vmem>>, vector<512x16xf32>,
    return
  }
  func.func @transform_0(%arg0: i32) -> (i32, i32) {
    %c0_i32 = arith.constant 0 : i32
    %c0_i32_0 = arith.constant 0 : i32
    return %arg0, %c0_i32 : i32, i32
  }
  func.func @transform_1(%arg0: i32) -> (i32, i32) {
    %c0_i32 = arith.constant 0 : i32
    %c0_i32_0 = arith.constant 0 : i32
    %c0_i32_1 = arith.constant 0 : i32
    return %c0_i32, %c0_i32_0 : i32, i32
  }
  func.func @transform_2(%arg0: i32) -> (i32, i32) {
    %c0_i32 = arith.constant 0 : i32
    %c0_i32_0 = arith.constant 0 : i32
    %c0_i32_1 = arith.constant 0 : i32
    return %c0_i32, %c0_i32_0 : i32, i32
  }
  func.func @transform_3(%arg0: i32) -> (i32, i32) {
    %c0_i32 = arith.constant 0 : i32
    %c0_i32_0 = arith.constant 0 : i32
    %c0_i32_1 = arith.constant 0 : i32
    return %c0_i32, %c0_i32_0 : i32, i32
  }
  func.func @transform_4(%arg0: i32) -> (i32, i32) {
    %c0_i32 = arith.constant 0 : i32
    %c0_i32_0 = arith.constant 0 : i32
    %c0_i32_1 = arith.constant 0 : i32
    return %c0_i32, %c0_i32_0 : i32, i32
  }
  func.func @transform_5(%arg0: i32) -> (i32, i32) {
    %c0_i32 = arith.constant 0 : i32
    %c0_i32_0 = arith.constant 0 : i32
    return %arg0, %c0_i32 : i32, i32
  }
}

</mosaic_0001>

<bundles_post_ra>
// kernel: tpu_custom_call.1
= control target key start
LH: loop header
LB: loop body
LE: loop exit
PB: predicated region body
PF: predicated region fallthrough
CT: control target
= control target key end

     0   :  { %vm95_vm0 = vcmask 261120   ;;  %vm752_vm1 = vcmask 523264   ;;  %vm1330_vm2 = vcmask 130048   ;;  %s2697_s1 = inlined_call_operand.vmem [shape: f32[32,64], index: 1, kind: input, shape index: {}]   ;;  %s2698_s0 = inlined_call_operand.vmem [shape: f32[512,32], index: 0, kind: input, shape index: {}]   ;;  %s2699_s3 = inlined_call_operand.vmem [shape: f32[64,16], index: 3, kind: input, shape index: {}]   ;;  %s2700_s2 = inlined_call_operand.vmem [shape: f32[1,64], index: 2, kind: input, shape index: {}]   ;;  %s2701_s4 = inlined_call_operand.vmem [shape: f32[1,16], index: 4, kind: input, shape index: {}]   ;;  %s2702_s5 = inlined_call_operand.vmem [shape: f32[512,16], index: 5, kind: output, shape index: {}]  }
   0x1   :  { %v84_v0 = vld [vmem:[%s2697_s1] sm:$0xff]  ;;  %v85_v1 = vld [vmem:[%s2697_s1 + $0x8] sm:$0xff]  ;;  %v86_v2 = vld [vmem:[%s2697_s1 + $0x10] sm:$0xff] }
   0x2   :  { %v1885_v3 = vpack.c.bf16 %v85_v1, %v84_v0  ;;  %v87_v4 = vld [vmem:[%s2697_s1 + $0x18] sm:$0xff]  ;;  %v20_v5 = vld [vmem:[%s2698_s0] sm:$0xff]  ;;  %v21_v7 = vld [vmem:[%s2698_s0 + $0x8] sm:$0xff] }
   0x3   :  { %v1889_v6 = vpack.c.bf16 %v87_v4, %v86_v2  ;;  %1677 = vmatprep.mubr.msk.f32.mxu0 %vm95_vm0, %v20_v5  ;;  %v22_v8 = vld [vmem:[%s2698_s0 + $0x10] sm:$0xff]  ;;  %v23_v9 = vld [vmem:[%s2698_s0 + $0x18] sm:$0xff]  ;;  %v24_v10 = vld [vmem:[%s2698_s0 + $0x20] sm:$0xff] }
   0x4   :  { %1886 = vmatprep.subr.bf16.mxu0 %v1885_v3  ;;  %v25_v11 = vld [vmem:[%s2698_s0 + $0x28] sm:$0xff]  ;;  %v26_v12 = vld [vmem:[%s2698_s0 + $0x30] sm:$0xff]  ;;  %v27_v13 = vld [vmem:[%s2698_s0 + $0x38] sm:$0xff] }
   0x5   :  { %1888 = vmatpush3.bf16.msra.mxu0 %v1885_v3  ;;  %v28_v14 = vld [vmem:[%s2698_s0 + $0x40] sm:$0xff]  ;;  %v738_v16 = vld [vmem:[%s2699_s3 + $0x8] sm:$0xff]  ;;  %v739_v17 = vld [vmem:[%s2699_s3 + $0x10] sm:$0xff] }
   0x6   :  { %1890 = vmatprep.subr.bf16.mxu0 %v1889_v6  ;;  %v737_v15 = vld [vmem:[%s2699_s3] sm:$0xff]  ;;  %v740_v18 = vld [vmem:[%s2699_s3 + $0x18] sm:$0xff]  ;;  %v29_v19 = vld [vmem:[%s2698_s0 + $0x48] sm:$0xff] }
   0x7   :  { %v1893_v20 = vpack.c.bf16 %v738_v16, %v737_v15  ;;  %v30_v21 = vld [vmem:[%s2698_s0 + $0x50] sm:$0xff]  ;;  %v1897_v22 = vpack.c.bf16 %v740_v18, %v739_v17  ;;  %v741_v23 = vld [vmem:[%s2699_s3 + $0x20] sm:$0xff]  ;;  %v742_v24 = vld [vmem:[%s2699_s3 + $0x28] sm:$0xff] }
   0x8   :  { %v31_v25 = vld [vmem:[%s2698_s0 + $0x58] sm:$0xff]  ;;  %v32_v26 = vld [vmem:[%s2698_s0 + $0x60] sm:$0xff]  ;;  %v1901_v27 = vpack.c.bf16 %v742_v24, %v741_v23  ;;  %v33_v28 = vld [vmem:[%s2698_s0 + $0x68] sm:$0xff] }
   0x9   :  { %1892 = vmatpush3.bf16.msra.mxu0 %v1889_v6  ;;  %1909 = vmatprep.subr.bf16.mxu1 %v1893_v20  ;;  %v34_v29 = vld [vmem:[%s2698_s0 + $0x70] sm:$0xff]  ;;  %v35_v30 = vld [vmem:[%s2698_s0 + $0x78] sm:$0xff]  ;;  %v36_v31 = vld [vmem:[%s2698_s0 + $0x80] sm:$0xff] }
   0xa   :  { %1894 = vmatprep.subr.bf16.mxu0 %v1893_v20  ;;  %1913 = vmatpush3.bf16.msra.mxu1 %v1893_v20  ;;  %v37_v32 = vld [vmem:[%s2698_s0 + $0x88] sm:$0xff]  ;;  %v38_v33 = vld [vmem:[%s2698_s0 + $0x90] sm:$0xff]  ;;  %v39_v34 = vld [vmem:[%s2698_s0 + $0x98] sm:$0xff] }
   0xb   :  { %1910 = vmatprep.subr.bf16.mxu1 %v1897_v22  ;;  %v40_v35 = vld [vmem:[%s2698_s0 + $0xa0] sm:$0xff]  ;;  %v41_v36 = vld [vmem:[%s2698_s0 + $0xa8] sm:$0xff]  ;;  %v42_v37 = vld [vmem:[%s2698_s0 + $0xb0] sm:$0xff] }
   0xc   :  { %1678 = vmatmul.mubr.msk.f32.vlgmr.msra.gmra.mrb[0].mxu0 %vm95_vm0, %v21_v7  ;;  %v43_v38 = vld [vmem:[%s2698_s0 + $0xb8] sm:$0xff]  ;;  %v44_v39 = vld [vmem:[%s2698_s0 + $0xc0] sm:$0xff]  ;;  %v45_v40 = vld [vmem:[%s2698_s0 + $0xc8] sm:$0xff] }
   0xd   :  { %1680 = vmatprep.mubr.msk.f32.mxu0 %vm95_vm0, %v22_v8  ;;  %1896 = vmatpush3.bf16.msra.mxu0 %v1893_v20  ;;  %v46_v41 = vld [vmem:[%s2698_s0 + $0xd0] sm:$0xff]  ;;  %v47_v42 = vld [vmem:[%s2698_s0 + $0xd8] sm:$0xff]  ;;  %v48_v43 = vld [vmem:[%s2698_s0 + $0xe0] sm:$0xff] }
   0xe   :  { %1898 = vmatprep.subr.bf16.mxu0 %v1897_v22  ;;  %1914 = vmatpush3.bf16.msra.mxu1 %v1897_v22  ;;  %v49_v44 = vld [vmem:[%s2698_s0 + $0xe8] sm:$0xff]  ;;  %v50_v45 = vld [vmem:[%s2698_s0 + $0xf0] sm:$0xff]  ;;  %v51_v46 = vld [vmem:[%s2698_s0 + $0xf8] sm:$0xff] }
   0xf   :  { %1911 = vmatprep.subr.bf16.mxu1 %v1901_v27  ;;  %v52_v47 = vld [vmem:[%s2698_s0 + $0x100] sm:$0xff]  ;;  %v53_v48 = vld [vmem:[%s2698_s0 + $0x108] sm:$0xff]  ;;  %v54_v49 = vld [vmem:[%s2698_s0 + $0x110] sm:$0xff] }
  0x10   :  { %1681 = vmatmul.mubr.msk.f32.gmra.mrb[2].mxu0 %vm95_vm0, %v23_v9  ;;  %v55_v50 = vld [vmem:[%s2698_s0 + $0x118] sm:$0xff]  ;;  %v56_v51 = vld [vmem:[%s2698_s0 + $0x120] sm:$0xff]  ;;  %v57_v52 = vld [vmem:[%s2698_s0 + $0x128] sm:$0xff] }
  0x11   :  { %1683 = vmatprep.mubr.msk.f32.mxu0 %vm95_vm0, %v24_v10  ;;  %1900 = vmatpush3.bf16.msra.mxu0 %v1897_v22  ;;  %v58_v53 = vld [vmem:[%s2698_s0 + $0x130] sm:$0xff]  ;;  %v59_v54 = vld [vmem:[%s2698_s0 + $0x138] sm:$0xff]  ;;  %v60_v55 = vld [vmem:[%s2698_s0 + $0x140] sm:$0xff] }
  0x12   :  { %1902 = vmatprep.subr.bf16.mxu0 %v1901_v27  ;;  %1915 = vmatpush3.bf16.msra.mxu1 %v1901_v27  ;;  %v61_v56 = vld [vmem:[%s2698_s0 + $0x148] sm:$0xff]  ;;  %v62_v57 = vld [vmem:[%s2698_s0 + $0x150] sm:$0xff]  ;;  %v63_v58 = vld [vmem:[%s2698_s0 + $0x158] sm:$0xff] }
  0x13   :  { %v64_v59 = vld [vmem:[%s2698_s0 + $0x160] sm:$0xff]  ;;  %v743_v60 = vld [vmem:[%s2699_s3 + $0x30] sm:$0xff]  ;;  %v744_v61 = vld [vmem:[%s2699_s3 + $0x38] sm:$0xff] }
  0x14   :  { %1684 = vmatmul.mubr.msk.f32.gmra.mrb[4].mxu0 %vm95_vm0, %v25_v11  ;;  %v1905_v62 = vpack.c.bf16 %v744_v61, %v743_v60  ;;  %v65_v63 = vld [vmem:[%s2698_s0 + $0x168] sm:$0xff]  ;;  %v66_v0 = vld [vmem:[%s2698_s0 + $0x170] sm:$0xff]  ;;  %v67_v1 = vld [vmem:[%s2698_s0 + $0x178] sm:$0xff] }
  0x15   :  { %1686 = vmatprep.mubr.msk.f32.mxu0 %vm95_vm0, %v26_v12  ;;  %1904 = vmatpush3.bf16.msra.mxu0 %v1901_v27  ;;  %v68_v2 = vld [vmem:[%s2698_s0 + $0x180] sm:$0xff]  ;;  %v69_v3 = vld [vmem:[%s2698_s0 + $0x188] sm:$0xff]  ;;  %v70_v4 = vld [vmem:[%s2698_s0 + $0x190] sm:$0xff] }
  0x16   :  { %1906 = vmatprep.subr.bf16.mxu0 %v1905_v62  ;;  %1912 = vmatprep.subr.bf16.mxu1 %v1905_v62  ;;  %v71_v5 = vld [vmem:[%s2698_s0 + $0x198] sm:$0xff]  ;;  %v72_v6 = vld [vmem:[%s2698_s0 + $0x1a0] sm:$0xff]  ;;  %v73_v7 = vld [vmem:[%s2698_s0 + $0x1a8] sm:$0xff] }
  0x17   :  { %1916 = vmatpush3.bf16.msra.mxu1 %v1905_v62  ;;  %v74_v8 = vld [vmem:[%s2698_s0 + $0x1b0] sm:$0xff]  ;;  %v75_v9 = vld [vmem:[%s2698_s0 + $0x1b8] sm:$0xff]  ;;  %v76_v10 = vld [vmem:[%s2698_s0 + $0x1c0] sm:$0xff] }
  0x18   :  { %1687 = vmatmul.mubr.msk.f32.gmra.mrb[6].mxu0 %vm95_vm0, %v27_v13  ;;  %v77_v11 = vld [vmem:[%s2698_s0 + $0x1c8] sm:$0xff]  ;;  %v78_v12 = vld [vmem:[%s2698_s0 + $0x1d0] sm:$0xff]  ;;  %v79_v13 = vld [vmem:[%s2698_s0 + $0x1d8] sm:$0xff] }
  0x19   :  { %1689 = vmatprep.mubr.msk.f32.mxu0 %vm95_vm0, %v28_v14  ;;  %1908 = vmatpush3.bf16.msra.mxu0 %v1905_v62  ;;  %v80_v14 = vld [vmem:[%s2698_s0 + $0x1e0] sm:$0xff]  ;;  %v81_v15 = vld [vmem:[%s2698_s0 + $0x1e8] sm:$0xff]  ;;  %v82_v16 = vld [vmem:[%s2698_s0 + $0x1f0] sm:$0xff] }
  0x1a   :  { %v83_v17 = vld [vmem:[%s2698_s0 + $0x1f8] sm:$0xff]  ;;  %v2242_v18 = vld [vmem:[%s2700_s2] ss:$0 sm:$0xff] }
  0x1c   :  { %1690 = vmatmul.mubr.msk.f32.gmra.mrb[8].mxu0 %vm95_vm0, %v29_v19 }
  0x1d   :  { %1692 = vmatprep.mubr.msk.f32.mxu0 %vm95_vm0, %v30_v21 }
  0x20   :  { %1693 = vmatmul.mubr.msk.f32.gmra.mrb[10].mxu0 %vm95_vm0, %v31_v25 }
  0x21   :  { %1695 = vmatprep.mubr.msk.f32.mxu0 %vm95_vm0, %v32_v26 }
  0x24   :  { %1696 = vmatmul.mubr.msk.f32.gmra.mrb[12].mxu0 %vm95_vm0, %v33_v28 }
  0x25   :  { %1698 = vmatprep.mubr.msk.f32.mxu0 %vm95_vm0, %v34_v29 }
  0x28   :  { %1699 = vmatmul.mubr.msk.f32.gmra.mrb[14].mxu0 %vm95_vm0, %v35_v30 }
  0x29   :  { %1701 = vmatprep.mubr.msk.f32.mxu0 %vm95_vm0, %v36_v31 }
  0x2c   :  { %1702 = vmatmul.mubr.msk.f32.gmra.mrb[16].mxu0 %vm95_vm0, %v37_v32 }
  0x2d   :  { %1704 = vmatprep.mubr.msk.f32.mxu0 %vm95_vm0, %v38_v33 }
  0x30   :  { %1705 = vmatmul.mubr.msk.f32.gmra.mrb[18].mxu0 %vm95_vm0, %v39_v34 }
  0x31   :  { %1707 = vmatprep.mubr.msk.f32.mxu0 %vm95_vm0, %v40_v35 }
  0x34   :  { %1708 = vmatmul.mubr.msk.f32.gmra.mrb[20].mxu0 %vm95_vm0, %v41_v36 }
  0x35   :  { %1710 = vmatprep.mubr.msk.f32.mxu0 %vm95_vm0, %v42_v37 }
  0x38   :  { %1711 = vmatmul.mubr.msk.f32.gmra.mrb[22].mxu0 %vm95_vm0, %v43_v38 }
  0x39   :  { %1713 = vmatprep.mubr.msk.f32.mxu0 %vm95_vm0, %v44_v39 }
  0x3c   :  { %1714 = vmatmul.mubr.msk.f32.gmra.mrb[24].mxu0 %vm95_vm0, %v45_v40 }
  0x3d   :  { %1716 = vmatprep.mubr.msk.f32.mxu0 %vm95_vm0, %v46_v41 }
  0x40   :  { %1717 = vmatmul.mubr.msk.f32.gmra.mrb[26].mxu0 %vm95_vm0, %v47_v42 }
  0x41   :  { %1719 = vmatprep.mubr.msk.f32.mxu0 %vm95_vm0, %v48_v43 }
  0x44   :  { %1720 = vmatmul.mubr.msk.f32.gmra.mrb[28].mxu0 %vm95_vm0, %v49_v44 }
  0x45   :  { %1722 = vmatprep.mubr.msk.f32.mxu0 %vm95_vm0, %v50_v45 }
  0x48   :  { %1723 = vmatmul.mubr.msk.f32.gmra.mrb[30].mxu0 %vm95_vm0, %v51_v46 }
  0x49   :  { %1725 = vmatprep.mubr.msk.f32.mxu0 %vm95_vm0, %v52_v47 }
  0x4c   :  { %1726 = vmatmul.mubr.msk.f32.gmra.mrb[32].mxu0 %vm95_vm0, %v53_v48 }
  0x4d   :  { %1728 = vmatprep.mubr.msk.f32.mxu0 %vm95_vm0, %v54_v49 }
  0x50   :  { %1729 = vmatmul.mubr.msk.f32.gmra.mrb[34].mxu0 %vm95_vm0, %v55_v50 }
  0x51   :  { %1731 = vmatprep.mubr.msk.f32.mxu0 %vm95_vm0, %v56_v51 }
  0x54   :  { %1732 = vmatmul.mubr.msk.f32.gmra.mrb[36].mxu0 %vm95_vm0, %v57_v52 }
  0x55   :  { %1734 = vmatprep.mubr.msk.f32.mxu0 %vm95_vm0, %v58_v53 }
  0x58   :  { %1735 = vmatmul.mubr.msk.f32.gmra.mrb[38].mxu0 %vm95_vm0, %v59_v54 }
  0x59   :  { %1737 = vmatprep.mubr.msk.f32.mxu0 %vm95_vm0, %v60_v55 }
  0x5c   :  { %1738 = vmatmul.mubr.msk.f32.gmra.mrb[40].mxu0 %vm95_vm0, %v61_v56 }
  0x5d   :  { %1740 = vmatprep.mubr.msk.f32.mxu0 %vm95_vm0, %v62_v57 }
  0x60   :  { %1741 = vmatmul.mubr.msk.f32.gmra.mrb[42].mxu0 %vm95_vm0, %v63_v58 }
  0x61   :  { %1743 = vmatprep.mubr.msk.f32.mxu0 %vm95_vm0, %v64_v59 }
  0x64   :  { %1744 = vmatmul.mubr.msk.f32.gmra.mrb[44].mxu0 %vm95_vm0, %v65_v63 }
  0x65   :  { %1746 = vmatprep.mubr.msk.f32.mxu0 %vm95_vm0, %v66_v0 }
  0x68   :  { %1747 = vmatmul.mubr.msk.f32.gmra.mrb[46].mxu0 %vm95_vm0, %v67_v1 }
  0x69   :  { %1749 = vmatprep.mubr.msk.f32.mxu0 %vm95_vm0, %v68_v2 }
  0x6c   :  { %1750 = vmatmul.mubr.msk.f32.gmra.mrb[48].mxu0 %vm95_vm0, %v69_v3 }
  0x6d   :  { %1752 = vmatprep.mubr.msk.f32.mxu0 %vm95_vm0, %v70_v4 }
  0x70   :  { %1753 = vmatmul.mubr.msk.f32.gmra.mrb[50].mxu0 %vm95_vm0, %v71_v5 }
  0x71   :  { %1755 = vmatprep.mubr.msk.f32.mxu0 %vm95_vm0, %v72_v6 }
  0x74   :  { %1756 = vmatmul.mubr.msk.f32.gmra.mrb[52].mxu0 %vm95_vm0, %v73_v7 }
  0x75   :  { %1758 = vmatprep.mubr.msk.f32.mxu0 %vm95_vm0, %v74_v8 }
  0x78   :  { %1759 = vmatmul.mubr.msk.f32.gmra.mrb[54].mxu0 %vm95_vm0, %v75_v9 }
  0x79   :  { %1761 = vmatprep.mubr.msk.f32.mxu0 %vm95_vm0, %v76_v10 }
  0x7c   :  { %1762 = vmatmul.mubr.msk.f32.gmra.mrb[56].mxu0 %vm95_vm0, %v77_v11 }
  0x7d   :  { %1764 = vmatprep.mubr.msk.f32.mxu0 %vm95_vm0, %v78_v12 }
  0x80   :  { %1765 = vmatmul.mubr.msk.f32.gmra.mrb[58].mxu0 %vm95_vm0, %v79_v13 }
  0x81   :  { %1767 = vmatprep.mubr.msk.f32.mxu0 %vm95_vm0, %v80_v14 }
  0x84   :  { %1768 = vmatmul.mubr.msk.f32.gmra.mrb[60].mxu0 %vm95_vm0, %v81_v15 }
  0x85   :  { %1770 = vmatprep.mubr.msk.f32.mxu0 %vm95_vm0, %v82_v16 }
  0x88   :  { %1771 = vmatmul.mubr.msk.f32.gmra.mrb[62].mxu0 %vm95_vm0, %v83_v17 }
  0xdf   :  { %v1679_v19 = vpop.f32.mrb[0].mxu0 }
  0xe0   :  { %v360_v20 = vadd.f32 %v1679_v19, %v2242_v18  ;;  %v354_v21 = vpop.f32.mrb[1].mxu0 }
  0xe1   :  { %v355_v22 = vadd.f32 %v2242_v18, %v354_v21 }
  0xe2   :  { %v674_v25 = vmax.f32 %v360_v20, 0.0 }
  0xe3   :  { %v673_v23 = vmax.f32 %v355_v22, 0.0  ;;  %v1682_v24 = vpop.f32.mrb[2].mxu0 }
  0xe4   :  { %v370_v26 = vadd.f32 %v1682_v24, %v2242_v18  ;;  %v364_v27 = vpop.f32.mrb[3].mxu0 }
  0xe5   :  { %v365_v28 = vadd.f32 %v2242_v18, %v364_v27  ;;  %1789 = vmatprep.mubr.msk.f32.mxu0 %vm752_vm1, %v673_v23 }
  0xe6   :  { %1790 = vmatmul.mubr.msk.f32.vlgmr.msra.gmra.mrb[64].mxu0 %vm752_vm1, %v674_v25  ;;  %v676_v31 = vmax.f32 %v370_v26, 0.0 }
  0xe7   :  { %v675_v29 = vmax.f32 %v365_v28, 0.0  ;;  %v1685_v30 = vpop.f32.mrb[4].mxu0 }
  0xe8   :  { %v380_v32 = vadd.f32 %v1685_v30, %v2242_v18  ;;  %v374_v33 = vpop.f32.mrb[5].mxu0 }
  0xe9   :  { %v375_v34 = vadd.f32 %v2242_v18, %v374_v33  ;;  %1792 = vmatprep.mubr.msk.f32.mxu1 %vm752_vm1, %v675_v29 }
  0xea   :  { %1793 = vmatmul.mubr.msk.f32.vlgmr.msra.gmra.mrb[0].mxu1 %vm752_vm1, %v676_v31  ;;  %v678_v37 = vmax.f32 %v380_v32, 0.0 }
  0xeb   :  { %v677_v35 = vmax.f32 %v375_v34, 0.0  ;;  %v1688_v36 = vpop.f32.mrb[6].mxu0 }
  0xec   :  { %v390_v38 = vadd.f32 %v1688_v36, %v2242_v18  ;;  %v384_v39 = vpop.f32.mrb[7].mxu0 }
  0xed   :  { %v385_v40 = vadd.f32 %v2242_v18, %v384_v39  ;;  %1795 = vmatprep.mubr.msk.f32.mxu1 %vm752_vm1, %v677_v35 }
  0xee   :  { %1796 = vmatmul.mubr.msk.f32.gmra.mrb[2].mxu1 %vm752_vm1, %v678_v37  ;;  %v680_v43 = vmax.f32 %v390_v38, 0.0 }
  0xef   :  { %v679_v41 = vmax.f32 %v385_v40, 0.0  ;;  %v1691_v42 = vpop.f32.mrb[8].mxu0 }
  0xf0   :  { %v400_v44 = vadd.f32 %v1691_v42, %v2242_v18  ;;  %v394_v45 = vpop.f32.mrb[9].mxu0 }
  0xf1   :  { %v395_v46 = vadd.f32 %v2242_v18, %v394_v45  ;;  %1798 = vmatprep.mubr.msk.f32.mxu1 %vm752_vm1, %v679_v41 }
  0xf2   :  { %1799 = vmatmul.mubr.msk.f32.gmra.mrb[4].mxu1 %vm752_vm1, %v680_v43  ;;  %v682_v49 = vmax.f32 %v400_v44, 0.0 }
  0xf3   :  { %v681_v47 = vmax.f32 %v395_v46, 0.0  ;;  %v1694_v48 = vpop.f32.mrb[10].mxu0 }
  0xf4   :  { %v410_v50 = vadd.f32 %v1694_v48, %v2242_v18  ;;  %v404_v51 = vpop.f32.mrb[11].mxu0 }
  0xf5   :  { %v405_v52 = vadd.f32 %v2242_v18, %v404_v51  ;;  %1801 = vmatprep.mubr.msk.f32.mxu1 %vm752_vm1, %v681_v47 }
  0xf6   :  { %1802 = vmatmul.mubr.msk.f32.gmra.mrb[6].mxu1 %vm752_vm1, %v682_v49  ;;  %v684_v55 = vmax.f32 %v410_v50, 0.0 }
  0xf7   :  { %v683_v53 = vmax.f32 %v405_v52, 0.0  ;;  %v1697_v54 = vpop.f32.mrb[12].mxu0 }
  0xf8   :  { %v420_v56 = vadd.f32 %v1697_v54, %v2242_v18  ;;  %v414_v57 = vpop.f32.mrb[13].mxu0 }
  0xf9   :  { %v415_v58 = vadd.f32 %v2242_v18, %v414_v57  ;;  %1804 = vmatprep.mubr.msk.f32.mxu1 %vm752_vm1, %v683_v53 }
  0xfa   :  { %1805 = vmatmul.mubr.msk.f32.gmra.mrb[8].mxu1 %vm752_vm1, %v684_v55  ;;  %v686_v61 = vmax.f32 %v420_v56, 0.0 }
  0xfb   :  { %v685_v59 = vmax.f32 %v415_v58, 0.0  ;;  %v1700_v60 = vpop.f32.mrb[14].mxu0 }
  0xfc   :  { %v430_v62 = vadd.f32 %v1700_v60, %v2242_v18  ;;  %v424_v63 = vpop.f32.mrb[15].mxu0 }
  0xfd   :  { %v425_v0 = vadd.f32 %v2242_v18, %v424_v63  ;;  %1807 = vmatprep.mubr.msk.f32.mxu1 %vm752_vm1, %v685_v59 }
  0xfe   :  { %1808 = vmatmul.mubr.msk.f32.gmra.mrb[10].mxu1 %vm752_vm1, %v686_v61  ;;  %v688_v3 = vmax.f32 %v430_v62, 0.0 }
  0xff   :  { %v687_v1 = vmax.f32 %v425_v0, 0.0  ;;  %v1703_v2 = vpop.f32.mrb[16].mxu0 }
 0x100   :  { %v440_v4 = vadd.f32 %v1703_v2, %v2242_v18  ;;  %v434_v5 = vpop.f32.mrb[17].mxu0 }
 0x101   :  { %v435_v6 = vadd.f32 %v2242_v18, %v434_v5  ;;  %1810 = vmatprep.mubr.msk.f32.mxu1 %vm752_vm1, %v687_v1 }
 0x102   :  { %1811 = vmatmul.mubr.msk.f32.gmra.mrb[12].mxu1 %vm752_vm1, %v688_v3  ;;  %v690_v9 = vmax.f32 %v440_v4, 0.0 }
 0x103   :  { %v689_v7 = vmax.f32 %v435_v6, 0.0  ;;  %v1706_v8 = vpop.f32.mrb[18].mxu0 }
 0x104   :  { %v450_v10 = vadd.f32 %v1706_v8, %v2242_v18  ;;  %v444_v11 = vpop.f32.mrb[19].mxu0 }
 0x105   :  { %v445_v12 = vadd.f32 %v2242_v18, %v444_v11  ;;  %1813 = vmatprep.mubr.msk.f32.mxu1 %vm752_vm1, %v689_v7 }
 0x106   :  { %1814 = vmatmul.mubr.msk.f32.gmra.mrb[14].mxu1 %vm752_vm1, %v690_v9  ;;  %v692_v15 = vmax.f32 %v450_v10, 0.0 }
 0x107   :  { %v691_v13 = vmax.f32 %v445_v12, 0.0  ;;  %v1709_v14 = vpop.f32.mrb[20].mxu0 }
 0x108   :  { %v460_v16 = vadd.f32 %v1709_v14, %v2242_v18  ;;  %v454_v17 = vpop.f32.mrb[21].mxu0 }
 0x109   :  { %v455_v19 = vadd.f32 %v2242_v18, %v454_v17  ;;  %1816 = vmatprep.mubr.msk.f32.mxu1 %vm752_vm1, %v691_v13 }
 0x10a   :  { %1817 = vmatmul.mubr.msk.f32.gmra.mrb[16].mxu1 %vm752_vm1, %v692_v15  ;;  %v694_v22 = vmax.f32 %v460_v16, 0.0 }
 0x10b   :  { %v693_v20 = vmax.f32 %v455_v19, 0.0  ;;  %v1712_v21 = vpop.f32.mrb[22].mxu0 }
 0x10c   :  { %v470_v23 = vadd.f32 %v1712_v21, %v2242_v18  ;;  %v464_v24 = vpop.f32.mrb[23].mxu0 }
 0x10d   :  { %v465_v25 = vadd.f32 %v2242_v18, %v464_v24  ;;  %1819 = vmatprep.mubr.msk.f32.mxu1 %vm752_vm1, %v693_v20 }
 0x10e   :  { %1820 = vmatmul.mubr.msk.f32.gmra.mrb[18].mxu1 %vm752_vm1, %v694_v22  ;;  %v696_v28 = vmax.f32 %v470_v23, 0.0 }
 0x10f   :  { %v695_v26 = vmax.f32 %v465_v25, 0.0  ;;  %v1715_v27 = vpop.f32.mrb[24].mxu0 }
 0x110   :  { %v480_v29 = vadd.f32 %v1715_v27, %v2242_v18  ;;  %v474_v30 = vpop.f32.mrb[25].mxu0 }
 0x111   :  { %v475_v31 = vadd.f32 %v2242_v18, %v474_v30  ;;  %1822 = vmatprep.mubr.msk.f32.mxu1 %vm752_vm1, %v695_v26 }
 0x112   :  { %1823 = vmatmul.mubr.msk.f32.gmra.mrb[20].mxu1 %vm752_vm1, %v696_v28  ;;  %v698_v34 = vmax.f32 %v480_v29, 0.0 }
 0x113   :  { %v697_v32 = vmax.f32 %v475_v31, 0.0  ;;  %v1718_v33 = vpop.f32.mrb[26].mxu0 }
 0x114   :  { %v490_v35 = vadd.f32 %v1718_v33, %v2242_v18  ;;  %v484_v36 = vpop.f32.mrb[27].mxu0 }
 0x115   :  { %v485_v37 = vadd.f32 %v2242_v18, %v484_v36  ;;  %1825 = vmatprep.mubr.msk.f32.mxu1 %vm752_vm1, %v697_v32 }
 0x116   :  { %1826 = vmatmul.mubr.msk.f32.gmra.mrb[22].mxu1 %vm752_vm1, %v698_v34  ;;  %v700_v40 = vmax.f32 %v490_v35, 0.0 }
 0x117   :  { %v699_v38 = vmax.f32 %v485_v37, 0.0  ;;  %v1721_v39 = vpop.f32.mrb[28].mxu0 }
 0x118   :  { %v500_v41 = vadd.f32 %v1721_v39, %v2242_v18  ;;  %v494_v42 = vpop.f32.mrb[29].mxu0 }
 0x119   :  { %v495_v43 = vadd.f32 %v2242_v18, %v494_v42  ;;  %1828 = vmatprep.mubr.msk.f32.mxu1 %vm752_vm1, %v699_v38 }
 0x11a   :  { %1829 = vmatmul.mubr.msk.f32.gmra.mrb[24].mxu1 %vm752_vm1, %v700_v40  ;;  %v702_v46 = vmax.f32 %v500_v41, 0.0 }
 0x11b   :  { %v701_v44 = vmax.f32 %v495_v43, 0.0  ;;  %v1724_v45 = vpop.f32.mrb[30].mxu0 }
 0x11c   :  { %v510_v47 = vadd.f32 %v1724_v45, %v2242_v18  ;;  %v504_v48 = vpop.f32.mrb[31].mxu0 }
 0x11d   :  { %v505_v49 = vadd.f32 %v2242_v18, %v504_v48  ;;  %1831 = vmatprep.mubr.msk.f32.mxu1 %vm752_vm1, %v701_v44 }
 0x11e   :  { %1832 = vmatmul.mubr.msk.f32.gmra.mrb[26].mxu1 %vm752_vm1, %v702_v46  ;;  %v704_v52 = vmax.f32 %v510_v47, 0.0 }
 0x11f   :  { %v703_v50 = vmax.f32 %v505_v49, 0.0  ;;  %v1727_v51 = vpop.f32.mrb[32].mxu0 }
 0x120   :  { %v520_v53 = vadd.f32 %v1727_v51, %v2242_v18  ;;  %v514_v54 = vpop.f32.mrb[33].mxu0 }
 0x121   :  { %v515_v55 = vadd.f32 %v2242_v18, %v514_v54  ;;  %1834 = vmatprep.mubr.msk.f32.mxu1 %vm752_vm1, %v703_v50 }
 0x122   :  { %1835 = vmatmul.mubr.msk.f32.gmra.mrb[28].mxu1 %vm752_vm1, %v704_v52  ;;  %v706_v58 = vmax.f32 %v520_v53, 0.0 }
 0x123   :  { %v705_v56 = vmax.f32 %v515_v55, 0.0  ;;  %v1730_v57 = vpop.f32.mrb[34].mxu0 }
 0x124   :  { %v530_v59 = vadd.f32 %v1730_v57, %v2242_v18  ;;  %v524_v60 = vpop.f32.mrb[35].mxu0 }
 0x125   :  { %v525_v61 = vadd.f32 %v2242_v18, %v524_v60  ;;  %1837 = vmatprep.mubr.msk.f32.mxu1 %vm752_vm1, %v705_v56 }
 0x126   :  { %1838 = vmatmul.mubr.msk.f32.gmra.mrb[30].mxu1 %vm752_vm1, %v706_v58  ;;  %v708_v0 = vmax.f32 %v530_v59, 0.0 }
 0x127   :  { %v707_v62 = vmax.f32 %v525_v61, 0.0  ;;  %v1733_v63 = vpop.f32.mrb[36].mxu0 }
 0x128   :  { %v540_v1 = vadd.f32 %v1733_v63, %v2242_v18  ;;  %v534_v2 = vpop.f32.mrb[37].mxu0 }
 0x129   :  { %v535_v3 = vadd.f32 %v2242_v18, %v534_v2  ;;  %1840 = vmatprep.mubr.msk.f32.mxu1 %vm752_vm1, %v707_v62 }
 0x12a   :  { %1841 = vmatmul.mubr.msk.f32.gmra.mrb[32].mxu1 %vm752_vm1, %v708_v0  ;;  %v710_v6 = vmax.f32 %v540_v1, 0.0 }
 0x12b   :  { %v709_v4 = vmax.f32 %v535_v3, 0.0  ;;  %v1736_v5 = vpop.f32.mrb[38].mxu0 }
 0x12c   :  { %v550_v7 = vadd.f32 %v1736_v5, %v2242_v18  ;;  %v544_v8 = vpop.f32.mrb[39].mxu0 }
 0x12d   :  { %v545_v9 = vadd.f32 %v2242_v18, %v544_v8  ;;  %1843 = vmatprep.mubr.msk.f32.mxu1 %vm752_vm1, %v709_v4 }
 0x12e   :  { %1844 = vmatmul.mubr.msk.f32.gmra.mrb[34].mxu1 %vm752_vm1, %v710_v6  ;;  %v712_v12 = vmax.f32 %v550_v7, 0.0 }
 0x12f   :  { %v711_v10 = vmax.f32 %v545_v9, 0.0  ;;  %v1739_v11 = vpop.f32.mrb[40].mxu0 }
 0x130   :  { %v560_v13 = vadd.f32 %v1739_v11, %v2242_v18  ;;  %v554_v14 = vpop.f32.mrb[41].mxu0 }
 0x131   :  { %v555_v15 = vadd.f32 %v2242_v18, %v554_v14  ;;  %1846 = vmatprep.mubr.msk.f32.mxu1 %vm752_vm1, %v711_v10 }
 0x132   :  { %1847 = vmatmul.mubr.msk.f32.gmra.mrb[36].mxu1 %vm752_vm1, %v712_v12  ;;  %v714_v19 = vmax.f32 %v560_v13, 0.0 }
 0x133   :  { %v713_v16 = vmax.f32 %v555_v15, 0.0  ;;  %v1742_v17 = vpop.f32.mrb[42].mxu0 }
 0x134   :  { %v570_v20 = vadd.f32 %v1742_v17, %v2242_v18  ;;  %v564_v21 = vpop.f32.mrb[43].mxu0 }
 0x135   :  { %v565_v22 = vadd.f32 %v2242_v18, %v564_v21  ;;  %1849 = vmatprep.mubr.msk.f32.mxu1 %vm752_vm1, %v713_v16 }
 0x136   :  { %1850 = vmatmul.mubr.msk.f32.gmra.mrb[38].mxu1 %vm752_vm1, %v714_v19  ;;  %v716_v25 = vmax.f32 %v570_v20, 0.0 }
 0x137   :  { %v715_v23 = vmax.f32 %v565_v22, 0.0  ;;  %v1745_v24 = vpop.f32.mrb[44].mxu0  ;;  %v2375_v22 = vld [vmem:[%s2701_s4] ss:$0 sm:$0xff] }
 0x138   :  { %v580_v26 = vadd.f32 %v1745_v24, %v2242_v18  ;;  %v574_v27 = vpop.f32.mrb[45].mxu0 }
 0x139   :  { %v575_v28 = vadd.f32 %v2242_v18, %v574_v27  ;;  %1852 = vmatprep.mubr.msk.f32.mxu1 %vm752_vm1, %v715_v23 }
 0x13a   :  { %1853 = vmatmul.mubr.msk.f32.gmra.mrb[40].mxu1 %vm752_vm1, %v716_v25  ;;  %v718_v31 = vmax.f32 %v580_v26, 0.0 }
 0x13b   :  { %v717_v29 = vmax.f32 %v575_v28, 0.0  ;;  %v1748_v30 = vpop.f32.mrb[46].mxu0 }
 0x13c   :  { %v590_v32 = vadd.f32 %v1748_v30, %v2242_v18  ;;  %v584_v33 = vpop.f32.mrb[47].mxu0 }
 0x13d   :  { %v585_v34 = vadd.f32 %v2242_v18, %v584_v33  ;;  %1855 = vmatprep.mubr.msk.f32.mxu1 %vm752_vm1, %v717_v29 }
 0x13e   :  { %1856 = vmatmul.mubr.msk.f32.gmra.mrb[42].mxu1 %vm752_vm1, %v718_v31  ;;  %v720_v37 = vmax.f32 %v590_v32, 0.0 }
 0x13f   :  { %v719_v35 = vmax.f32 %v585_v34, 0.0  ;;  %v1751_v36 = vpop.f32.mrb[48].mxu0 }
 0x140   :  { %v600_v38 = vadd.f32 %v1751_v36, %v2242_v18  ;;  %v594_v39 = vpop.f32.mrb[49].mxu0 }
 0x141   :  { %v595_v40 = vadd.f32 %v2242_v18, %v594_v39  ;;  %1858 = vmatprep.mubr.msk.f32.mxu1 %vm752_vm1, %v719_v35 }
 0x142   :  { %1859 = vmatmul.mubr.msk.f32.gmra.mrb[44].mxu1 %vm752_vm1, %v720_v37  ;;  %v722_v43 = vmax.f32 %v600_v38, 0.0 }
 0x143   :  { %v721_v41 = vmax.f32 %v595_v40, 0.0  ;;  %v1754_v42 = vpop.f32.mrb[50].mxu0 }
 0x144   :  { %v610_v44 = vadd.f32 %v1754_v42, %v2242_v18  ;;  %v604_v45 = vpop.f32.mrb[51].mxu0 }
 0x145   :  { %v605_v46 = vadd.f32 %v2242_v18, %v604_v45  ;;  %1861 = vmatprep.mubr.msk.f32.mxu1 %vm752_vm1, %v721_v41 }
 0x146   :  { %1862 = vmatmul.mubr.msk.f32.gmra.mrb[46].mxu1 %vm752_vm1, %v722_v43  ;;  %v724_v49 = vmax.f32 %v610_v44, 0.0 }
 0x147   :  { %v723_v47 = vmax.f32 %v605_v46, 0.0  ;;  %v1757_v48 = vpop.f32.mrb[52].mxu0 }
 0x148   :  { %v620_v50 = vadd.f32 %v1757_v48, %v2242_v18  ;;  %v614_v51 = vpop.f32.mrb[53].mxu0 }
 0x149   :  { %v615_v52 = vadd.f32 %v2242_v18, %v614_v51  ;;  %1864 = vmatprep.mubr.msk.f32.mxu1 %vm752_vm1, %v723_v47 }
 0x14a   :  { %1865 = vmatmul.mubr.msk.f32.gmra.mrb[48].mxu1 %vm752_vm1, %v724_v49  ;;  %v726_v55 = vmax.f32 %v620_v50, 0.0 }
 0x14b   :  { %v725_v53 = vmax.f32 %v615_v52, 0.0  ;;  %v1760_v54 = vpop.f32.mrb[54].mxu0 }
 0x14c   :  { %v630_v56 = vadd.f32 %v1760_v54, %v2242_v18  ;;  %v624_v57 = vpop.f32.mrb[55].mxu0 }
 0x14d   :  { %v625_v58 = vadd.f32 %v2242_v18, %v624_v57  ;;  %1867 = vmatprep.mubr.msk.f32.mxu1 %vm752_vm1, %v725_v53 }
 0x14e   :  { %1868 = vmatmul.mubr.msk.f32.gmra.mrb[50].mxu1 %vm752_vm1, %v726_v55  ;;  %v728_v61 = vmax.f32 %v630_v56, 0.0 }
 0x14f   :  { %v727_v59 = vmax.f32 %v625_v58, 0.0  ;;  %v1763_v60 = vpop.f32.mrb[56].mxu0 }
 0x150   :  { %v640_v62 = vadd.f32 %v1763_v60, %v2242_v18  ;;  %v634_v63 = vpop.f32.mrb[57].mxu0 }
 0x151   :  { %v635_v0 = vadd.f32 %v2242_v18, %v634_v63  ;;  %1870 = vmatprep.mubr.msk.f32.mxu1 %vm752_vm1, %v727_v59 }
 0x152   :  { %1871 = vmatmul.mubr.msk.f32.gmra.mrb[52].mxu1 %vm752_vm1, %v728_v61  ;;  %v730_v3 = vmax.f32 %v640_v62, 0.0 }
 0x153   :  { %v729_v1 = vmax.f32 %v635_v0, 0.0  ;;  %v1766_v2 = vpop.f32.mrb[58].mxu0 }
 0x154   :  { %v650_v4 = vadd.f32 %v1766_v2, %v2242_v18  ;;  %v644_v5 = vpop.f32.mrb[59].mxu0 }
 0x155   :  { %v645_v6 = vadd.f32 %v2242_v18, %v644_v5  ;;  %1873 = vmatprep.mubr.msk.f32.mxu1 %vm752_vm1, %v729_v1 }
 0x156   :  { %1874 = vmatmul.mubr.msk.f32.gmra.mrb[54].mxu1 %vm752_vm1, %v730_v3  ;;  %v732_v9 = vmax.f32 %v650_v4, 0.0 }
 0x157   :  { %v731_v7 = vmax.f32 %v645_v6, 0.0  ;;  %v1769_v8 = vpop.f32.mrb[60].mxu0 }
 0x158   :  { %v660_v10 = vadd.f32 %v1769_v8, %v2242_v18  ;;  %v654_v11 = vpop.f32.mrb[61].mxu0 }
 0x159   :  { %v655_v12 = vadd.f32 %v2242_v18, %v654_v11  ;;  %1876 = vmatprep.mubr.msk.f32.mxu1 %vm752_vm1, %v731_v7 }
 0x15a   :  { %1877 = vmatmul.mubr.msk.f32.gmra.mrb[56].mxu1 %vm752_vm1, %v732_v9  ;;  %v734_v15 = vmax.f32 %v660_v10, 0.0 }
 0x15b   :  { %v733_v13 = vmax.f32 %v655_v12, 0.0  ;;  %v1772_v14 = vpop.f32.mrb[62].mxu0 }
 0x15c   :  { %v670_v16 = vadd.f32 %v1772_v14, %v2242_v18  ;;  %v664_v17 = vpop.f32.mrb[63].mxu0 }
 0x15d   :  { %v665_v19 = vadd.f32 %v2242_v18, %v664_v17  ;;  %1879 = vmatprep.mubr.msk.f32.mxu1 %vm752_vm1, %v733_v13 }
 0x15e   :  { %1880 = vmatmul.mubr.msk.f32.gmra.mrb[58].mxu1 %vm752_vm1, %v734_v15  ;;  %v736_v21 = vmax.f32 %v670_v16, 0.0 }
 0x15f   :  { %v735_v20 = vmax.f32 %v665_v19, 0.0 }
 0x161   :  { %1882 = vmatprep.mubr.msk.f32.mxu1 %vm752_vm1, %v735_v20 }
 0x162   :  { %1883 = vmatmul.mubr.msk.f32.gmra.mrb[60].mxu1 %vm752_vm1, %v736_v21 }
 0x1b9   :  { %v1791_v23 = vpop.f32.mrb[64].mxu0 }
 0x1ba   :  { %v1017_v24 = vadd.f32 %v1791_v23, %v2375_v22  ;;  %v1011_v18 = vpop.f32.mrb[65].mxu0 }
 0x1bb   :  { %v1012_v25 = vadd.f32 %v2375_v22, %v1011_v18 }
 0x1bc   :  { %1332 = vst.msk [vmem:[%s2702_s5 + $0x8] sm:$0xff] %vm1330_vm2, %v1017_v24 }
 0x1bd   :  { %1331 = vst.msk [vmem:[%s2702_s5] sm:$0xff] %vm1330_vm2, %v1012_v25  ;;  %v1794_v26 = vpop.f32.mrb[0].mxu1 }
 0x1be   :  { %v1027_v27 = vadd.f32 %v1794_v26, %v2375_v22  ;;  %v1021_v28 = vpop.f32.mrb[1].mxu1 }
 0x1bf   :  { %v1022_v29 = vadd.f32 %v2375_v22, %v1021_v28 }
 0x1c0   :  { %1334 = vst.msk [vmem:[%s2702_s5 + $0x18] sm:$0xff] %vm1330_vm2, %v1027_v27 }
 0x1c1   :  { %1333 = vst.msk [vmem:[%s2702_s5 + $0x10] sm:$0xff] %vm1330_vm2, %v1022_v29  ;;  %v1797_v30 = vpop.f32.mrb[2].mxu1 }
 0x1c2   :  { %v1037_v31 = vadd.f32 %v1797_v30, %v2375_v22  ;;  %v1031_v32 = vpop.f32.mrb[3].mxu1 }
 0x1c3   :  { %v1032_v33 = vadd.f32 %v2375_v22, %v1031_v32 }
 0x1c4   :  { %1336 = vst.msk [vmem:[%s2702_s5 + $0x28] sm:$0xff] %vm1330_vm2, %v1037_v31 }
 0x1c5   :  { %1335 = vst.msk [vmem:[%s2702_s5 + $0x20] sm:$0xff] %vm1330_vm2, %v1032_v33  ;;  %v1800_v34 = vpop.f32.mrb[4].mxu1 }
 0x1c6   :  { %v1047_v35 = vadd.f32 %v1800_v34, %v2375_v22  ;;  %v1041_v36 = vpop.f32.mrb[5].mxu1 }
 0x1c7   :  { %v1042_v37 = vadd.f32 %v2375_v22, %v1041_v36 }
 0x1c8   :  { %1338 = vst.msk [vmem:[%s2702_s5 + $0x38] sm:$0xff] %vm1330_vm2, %v1047_v35 }
 0x1c9   :  { %1337 = vst.msk [vmem:[%s2702_s5 + $0x30] sm:$0xff] %vm1330_vm2, %v1042_v37  ;;  %v1803_v38 = vpop.f32.mrb[6].mxu1 }
 0x1ca   :  { %v1057_v39 = vadd.f32 %v1803_v38, %v2375_v22  ;;  %v1051_v40 = vpop.f32.mrb[7].mxu1 }
 0x1cb   :  { %v1052_v41 = vadd.f32 %v2375_v22, %v1051_v40 }
 0x1cc   :  { %1340 = vst.msk [vmem:[%s2702_s5 + $0x48] sm:$0xff] %vm1330_vm2, %v1057_v39 }
 0x1cd   :  { %1339 = vst.msk [vmem:[%s2702_s5 + $0x40] sm:$0xff] %vm1330_vm2, %v1052_v41  ;;  %v1806_v42 = vpop.f32.mrb[8].mxu1 }
 0x1ce   :  { %v1067_v43 = vadd.f32 %v1806_v42, %v2375_v22  ;;  %v1061_v44 = vpop.f32.mrb[9].mxu1 }
 0x1cf   :  { %v1062_v45 = vadd.f32 %v2375_v22, %v1061_v44 }
 0x1d0   :  { %1342 = vst.msk [vmem:[%s2702_s5 + $0x58] sm:$0xff] %vm1330_vm2, %v1067_v43 }
 0x1d1   :  { %1341 = vst.msk [vmem:[%s2702_s5 + $0x50] sm:$0xff] %vm1330_vm2, %v1062_v45  ;;  %v1809_v46 = vpop.f32.mrb[10].mxu1 }
 0x1d2   :  { %v1077_v47 = vadd.f32 %v1809_v46, %v2375_v22  ;;  %v1071_v48 = vpop.f32.mrb[11].mxu1 }
 0x1d3   :  { %v1072_v49 = vadd.f32 %v2375_v22, %v1071_v48 }
 0x1d4   :  { %1344 = vst.msk [vmem:[%s2702_s5 + $0x68] sm:$0xff] %vm1330_vm2, %v1077_v47 }
 0x1d5   :  { %1343 = vst.msk [vmem:[%s2702_s5 + $0x60] sm:$0xff] %vm1330_vm2, %v1072_v49  ;;  %v1812_v50 = vpop.f32.mrb[12].mxu1 }
 0x1d6   :  { %v1087_v51 = vadd.f32 %v1812_v50, %v2375_v22  ;;  %v1081_v52 = vpop.f32.mrb[13].mxu1 }
 0x1d7   :  { %v1082_v53 = vadd.f32 %v2375_v22, %v1081_v52 }
 0x1d8   :  { %1346 = vst.msk [vmem:[%s2702_s5 + $0x78] sm:$0xff] %vm1330_vm2, %v1087_v51 }
 0x1d9   :  { %1345 = vst.msk [vmem:[%s2702_s5 + $0x70] sm:$0xff] %vm1330_vm2, %v1082_v53  ;;  %v1815_v54 = vpop.f32.mrb[14].mxu1 }
 0x1da   :  { %v1097_v55 = vadd.f32 %v1815_v54, %v2375_v22  ;;  %v1091_v56 = vpop.f32.mrb[15].mxu1 }
 0x1db   :  { %v1092_v57 = vadd.f32 %v2375_v22, %v1091_v56 }
 0x1dc   :  { %1348 = vst.msk [vmem:[%s2702_s5 + $0x88] sm:$0xff] %vm1330_vm2, %v1097_v55 }
 0x1dd   :  { %1347 = vst.msk [vmem:[%s2702_s5 + $0x80] sm:$0xff] %vm1330_vm2, %v1092_v57  ;;  %v1818_v58 = vpop.f32.mrb[16].mxu1 }
 0x1de   :  { %v1107_v59 = vadd.f32 %v1818_v58, %v2375_v22  ;;  %v1101_v60 = vpop.f32.mrb[17].mxu1 }
 0x1df   :  { %v1102_v61 = vadd.f32 %v2375_v22, %v1101_v60 }
 0x1e0   :  { %1350 = vst.msk [vmem:[%s2702_s5 + $0x98] sm:$0xff] %vm1330_vm2, %v1107_v59 }
 0x1e1   :  { %1349 = vst.msk [vmem:[%s2702_s5 + $0x90] sm:$0xff] %vm1330_vm2, %v1102_v61  ;;  %v1821_v62 = vpop.f32.mrb[18].mxu1 }
 0x1e2   :  { %v1117_v63 = vadd.f32 %v1821_v62, %v2375_v22  ;;  %v1111_v0 = vpop.f32.mrb[19].mxu1 }
 0x1e3   :  { %v1112_v1 = vadd.f32 %v2375_v22, %v1111_v0 }
 0x1e4   :  { %1352 = vst.msk [vmem:[%s2702_s5 + $0xa8] sm:$0xff] %vm1330_vm2, %v1117_v63 }
 0x1e5   :  { %1351 = vst.msk [vmem:[%s2702_s5 + $0xa0] sm:$0xff] %vm1330_vm2, %v1112_v1  ;;  %v1824_v2 = vpop.f32.mrb[20].mxu1 }
 0x1e6   :  { %v1127_v3 = vadd.f32 %v1824_v2, %v2375_v22  ;;  %v1121_v4 = vpop.f32.mrb[21].mxu1 }
 0x1e7   :  { %v1122_v5 = vadd.f32 %v2375_v22, %v1121_v4 }
 0x1e8   :  { %1354 = vst.msk [vmem:[%s2702_s5 + $0xb8] sm:$0xff] %vm1330_vm2, %v1127_v3 }
 0x1e9   :  { %1353 = vst.msk [vmem:[%s2702_s5 + $0xb0] sm:$0xff] %vm1330_vm2, %v1122_v5  ;;  %v1827_v6 = vpop.f32.mrb[22].mxu1 }
 0x1ea   :  { %v1137_v7 = vadd.f32 %v1827_v6, %v2375_v22  ;;  %v1131_v8 = vpop.f32.mrb[23].mxu1 }
 0x1eb   :  { %v1132_v9 = vadd.f32 %v2375_v22, %v1131_v8 }
 0x1ec   :  { %1356 = vst.msk [vmem:[%s2702_s5 + $0xc8] sm:$0xff] %vm1330_vm2, %v1137_v7 }
 0x1ed   :  { %1355 = vst.msk [vmem:[%s2702_s5 + $0xc0] sm:$0xff] %vm1330_vm2, %v1132_v9  ;;  %v1830_v10 = vpop.f32.mrb[24].mxu1 }
 0x1ee   :  { %v1147_v11 = vadd.f32 %v1830_v10, %v2375_v22  ;;  %v1141_v12 = vpop.f32.mrb[25].mxu1 }
 0x1ef   :  { %v1142_v13 = vadd.f32 %v2375_v22, %v1141_v12 }
 0x1f0   :  { %1358 = vst.msk [vmem:[%s2702_s5 + $0xd8] sm:$0xff] %vm1330_vm2, %v1147_v11 }
 0x1f1   :  { %1357 = vst.msk [vmem:[%s2702_s5 + $0xd0] sm:$0xff] %vm1330_vm2, %v1142_v13  ;;  %v1833_v14 = vpop.f32.mrb[26].mxu1 }
 0x1f2   :  { %v1157_v15 = vadd.f32 %v1833_v14, %v2375_v22  ;;  %v1151_v16 = vpop.f32.mrb[27].mxu1 }
 0x1f3   :  { %v1152_v17 = vadd.f32 %v2375_v22, %v1151_v16 }
 0x1f4   :  { %1360 = vst.msk [vmem:[%s2702_s5 + $0xe8] sm:$0xff] %vm1330_vm2, %v1157_v15 }
 0x1f5   :  { %1359 = vst.msk [vmem:[%s2702_s5 + $0xe0] sm:$0xff] %vm1330_vm2, %v1152_v17  ;;  %v1836_v19 = vpop.f32.mrb[28].mxu1 }
 0x1f6   :  { %v1167_v20 = vadd.f32 %v1836_v19, %v2375_v22  ;;  %v1161_v21 = vpop.f32.mrb[29].mxu1 }
 0x1f7   :  { %v1162_v23 = vadd.f32 %v2375_v22, %v1161_v21 }
 0x1f8   :  { %1362 = vst.msk [vmem:[%s2702_s5 + $0xf8] sm:$0xff] %vm1330_vm2, %v1167_v20 }
 0x1f9   :  { %1361 = vst.msk [vmem:[%s2702_s5 + $0xf0] sm:$0xff] %vm1330_vm2, %v1162_v23  ;;  %v1839_v24 = vpop.f32.mrb[30].mxu1 }
 0x1fa   :  { %v1177_v18 = vadd.f32 %v1839_v24, %v2375_v22  ;;  %v1171_v25 = vpop.f32.mrb[31].mxu1 }
 0x1fb   :  { %v1172_v26 = vadd.f32 %v2375_v22, %v1171_v25 }
 0x1fc   :  { %1364 = vst.msk [vmem:[%s2702_s5 + $0x108] sm:$0xff] %vm1330_vm2, %v1177_v18 }
 0x1fd   :  { %1363 = vst.msk [vmem:[%s2702_s5 + $0x100] sm:$0xff] %vm1330_vm2, %v1172_v26  ;;  %v1842_v27 = vpop.f32.mrb[32].mxu1 }
 0x1fe   :  { %v1187_v28 = vadd.f32 %v1842_v27, %v2375_v22  ;;  %v1181_v29 = vpop.f32.mrb[33].mxu1 }
 0x1ff   :  { %v1182_v30 = vadd.f32 %v2375_v22, %v1181_v29 }
 0x200   :  { %1366 = vst.msk [vmem:[%s2702_s5 + $0x118] sm:$0xff] %vm1330_vm2, %v1187_v28 }
 0x201   :  { %1365 = vst.msk [vmem:[%s2702_s5 + $0x110] sm:$0xff] %vm1330_vm2, %v1182_v30  ;;  %v1845_v31 = vpop.f32.mrb[34].mxu1 }
 0x202   :  { %v1197_v32 = vadd.f32 %v1845_v31, %v2375_v22  ;;  %v1191_v33 = vpop.f32.mrb[35].mxu1 }
 0x203   :  { %v1192_v34 = vadd.f32 %v2375_v22, %v1191_v33 }
 0x204   :  { %1368 = vst.msk [vmem:[%s2702_s5 + $0x128] sm:$0xff] %vm1330_vm2, %v1197_v32 }
 0x205   :  { %1367 = vst.msk [vmem:[%s2702_s5 + $0x120] sm:$0xff] %vm1330_vm2, %v1192_v34  ;;  %v1848_v35 = vpop.f32.mrb[36].mxu1 }
 0x206   :  { %v1207_v36 = vadd.f32 %v1848_v35, %v2375_v22  ;;  %v1201_v37 = vpop.f32.mrb[37].mxu1 }
 0x207   :  { %v1202_v38 = vadd.f32 %v2375_v22, %v1201_v37 }
 0x208   :  { %1370 = vst.msk [vmem:[%s2702_s5 + $0x138] sm:$0xff] %vm1330_vm2, %v1207_v36 }
 0x209   :  { %1369 = vst.msk [vmem:[%s2702_s5 + $0x130] sm:$0xff] %vm1330_vm2, %v1202_v38  ;;  %v1851_v39 = vpop.f32.mrb[38].mxu1 }
 0x20a   :  { %v1217_v40 = vadd.f32 %v1851_v39, %v2375_v22  ;;  %v1211_v41 = vpop.f32.mrb[39].mxu1 }
 0x20b   :  { %v1212_v42 = vadd.f32 %v2375_v22, %v1211_v41 }
 0x20c   :  { %1372 = vst.msk [vmem:[%s2702_s5 + $0x148] sm:$0xff] %vm1330_vm2, %v1217_v40 }
 0x20d   :  { %1371 = vst.msk [vmem:[%s2702_s5 + $0x140] sm:$0xff] %vm1330_vm2, %v1212_v42  ;;  %v1854_v43 = vpop.f32.mrb[40].mxu1 }
 0x20e   :  { %v1227_v44 = vadd.f32 %v1854_v43, %v2375_v22  ;;  %v1221_v45 = vpop.f32.mrb[41].mxu1 }
 0x20f   :  { %v1222_v46 = vadd.f32 %v2375_v22, %v1221_v45 }
 0x210   :  { %1374 = vst.msk [vmem:[%s2702_s5 + $0x158] sm:$0xff] %vm1330_vm2, %v1227_v44 }
 0x211   :  { %1373 = vst.msk [vmem:[%s2702_s5 + $0x150] sm:$0xff] %vm1330_vm2, %v1222_v46  ;;  %v1857_v47 = vpop.f32.mrb[42].mxu1 }
 0x212   :  { %v1237_v48 = vadd.f32 %v1857_v47, %v2375_v22  ;;  %v1231_v49 = vpop.f32.mrb[43].mxu1 }
 0x213   :  { %v1232_v50 = vadd.f32 %v2375_v22, %v1231_v49 }
 0x214   :  { %1376 = vst.msk [vmem:[%s2702_s5 + $0x168] sm:$0xff] %vm1330_vm2, %v1237_v48 }
 0x215   :  { %1375 = vst.msk [vmem:[%s2702_s5 + $0x160] sm:$0xff] %vm1330_vm2, %v1232_v50  ;;  %v1860_v51 = vpop.f32.mrb[44].mxu1 }
 0x216   :  { %v1247_v52 = vadd.f32 %v1860_v51, %v2375_v22  ;;  %v1241_v53 = vpop.f32.mrb[45].mxu1 }
 0x217   :  { %v1242_v54 = vadd.f32 %v2375_v22, %v1241_v53 }
 0x218   :  { %1378 = vst.msk [vmem:[%s2702_s5 + $0x178] sm:$0xff] %vm1330_vm2, %v1247_v52 }
 0x219   :  { %1377 = vst.msk [vmem:[%s2702_s5 + $0x170] sm:$0xff] %vm1330_vm2, %v1242_v54  ;;  %v1863_v55 = vpop.f32.mrb[46].mxu1 }
 0x21a   :  { %v1257_v56 = vadd.f32 %v1863_v55, %v2375_v22  ;;  %v1251_v57 = vpop.f32.mrb[47].mxu1 }
 0x21b   :  { %v1252_v58 = vadd.f32 %v2375_v22, %v1251_v57 }
 0x21c   :  { %1380 = vst.msk [vmem:[%s2702_s5 + $0x188] sm:$0xff] %vm1330_vm2, %v1257_v56 }
 0x21d   :  { %1379 = vst.msk [vmem:[%s2702_s5 + $0x180] sm:$0xff] %vm1330_vm2, %v1252_v58  ;;  %v1866_v59 = vpop.f32.mrb[48].mxu1 }
 0x21e   :  { %v1267_v60 = vadd.f32 %v1866_v59, %v2375_v22  ;;  %v1261_v61 = vpop.f32.mrb[49].mxu1 }
 0x21f   :  { %v1262_v62 = vadd.f32 %v2375_v22, %v1261_v61 }
 0x220   :  { %1382 = vst.msk [vmem:[%s2702_s5 + $0x198] sm:$0xff] %vm1330_vm2, %v1267_v60 }
 0x221   :  { %1381 = vst.msk [vmem:[%s2702_s5 + $0x190] sm:$0xff] %vm1330_vm2, %v1262_v62  ;;  %v1869_v63 = vpop.f32.mrb[50].mxu1 }
 0x222   :  { %v1277_v0 = vadd.f32 %v1869_v63, %v2375_v22  ;;  %v1271_v1 = vpop.f32.mrb[51].mxu1 }
 0x223   :  { %v1272_v2 = vadd.f32 %v2375_v22, %v1271_v1 }
 0x224   :  { %1384 = vst.msk [vmem:[%s2702_s5 + $0x1a8] sm:$0xff] %vm1330_vm2, %v1277_v0 }
 0x225   :  { %1383 = vst.msk [vmem:[%s2702_s5 + $0x1a0] sm:$0xff] %vm1330_vm2, %v1272_v2  ;;  %v1872_v3 = vpop.f32.mrb[52].mxu1 }
 0x226   :  { %v1287_v4 = vadd.f32 %v1872_v3, %v2375_v22  ;;  %v1281_v5 = vpop.f32.mrb[53].mxu1 }
 0x227   :  { %v1282_v6 = vadd.f32 %v2375_v22, %v1281_v5 }
 0x228   :  { %1386 = vst.msk [vmem:[%s2702_s5 + $0x1b8] sm:$0xff] %vm1330_vm2, %v1287_v4 }
 0x229   :  { %1385 = vst.msk [vmem:[%s2702_s5 + $0x1b0] sm:$0xff] %vm1330_vm2, %v1282_v6  ;;  %v1875_v7 = vpop.f32.mrb[54].mxu1 }
 0x22a   :  { %v1297_v8 = vadd.f32 %v1875_v7, %v2375_v22  ;;  %v1291_v9 = vpop.f32.mrb[55].mxu1 }
 0x22b   :  { %v1292_v10 = vadd.f32 %v2375_v22, %v1291_v9 }
 0x22c   :  { %1388 = vst.msk [vmem:[%s2702_s5 + $0x1c8] sm:$0xff] %vm1330_vm2, %v1297_v8 }
 0x22d   :  { %1387 = vst.msk [vmem:[%s2702_s5 + $0x1c0] sm:$0xff] %vm1330_vm2, %v1292_v10  ;;  %v1878_v11 = vpop.f32.mrb[56].mxu1 }
 0x22e   :  { %v1307_v12 = vadd.f32 %v1878_v11, %v2375_v22  ;;  %v1301_v13 = vpop.f32.mrb[57].mxu1 }
 0x22f   :  { %v1302_v14 = vadd.f32 %v2375_v22, %v1301_v13 }
 0x230   :  { %1390 = vst.msk [vmem:[%s2702_s5 + $0x1d8] sm:$0xff] %vm1330_vm2, %v1307_v12 }
 0x231   :  { %1389 = vst.msk [vmem:[%s2702_s5 + $0x1d0] sm:$0xff] %vm1330_vm2, %v1302_v14  ;;  %v1881_v15 = vpop.f32.mrb[58].mxu1 }
 0x232   :  { %v1317_v16 = vadd.f32 %v1881_v15, %v2375_v22  ;;  %v1311_v17 = vpop.f32.mrb[59].mxu1 }
 0x233   :  { %v1312_v19 = vadd.f32 %v2375_v22, %v1311_v17 }
 0x234   :  { %1392 = vst.msk [vmem:[%s2702_s5 + $0x1e8] sm:$0xff] %vm1330_vm2, %v1317_v16 }
 0x235   :  { %1391 = vst.msk [vmem:[%s2702_s5 + $0x1e0] sm:$0xff] %vm1330_vm2, %v1312_v19  ;;  %v1884_v20 = vpop.f32.mrb[60].mxu1 }
 0x236   :  { %v1327_v21 = vadd.f32 %v1884_v20, %v2375_v22  ;;  %v1321_v23 = vpop.f32.mrb[61].mxu1 }
 0x237   :  { %v1322_v24 = vadd.f32 %v2375_v22, %v1321_v23 }
 0x238   :  { %1394 = vst.msk [vmem:[%s2702_s5 + $0x1f8] sm:$0xff] %vm1330_vm2, %v1327_v21 }
 0x239   :  { %1393 = vst.msk [vmem:[%s2702_s5 + $0x1f0] sm:$0xff] %vm1330_vm2, %v1322_v24 }

</bundles_post_ra>
